<compile_context>
chip_gen: v5e
topology: v5e:2x2
jax: 0.10.0
libtpu: 0.0.40
codegen_flags: <defaults>
</compile_context>

<pallas_src>
import math

import jax
import jax.numpy as jnp
from jax.experimental import pallas as pl
from jax.experimental.pallas import tpu as pltpu

# ----------------------------- config -------------------------------------
B = 2           # batch
T = 8           # sequence length
C = 32          # n_embd
NH = 4          # n_head
HD = C // NH    # head dim
R = B * T       # total activation rows
NCOL = NH * R   # score columns: (head, key-row) pairs
EPS = 1e-5      # LayerNorm eps (PyTorch default)

# power-of-two shift/mask trick for the iota-based masks
assert (HD & (HD - 1)) == 0 and (T & (T - 1)) == 0 and (R & (R - 1)) == 0
LOG2_HD = HD.bit_length() - 1
LOG2_T = T.bit_length() - 1
LOG2_R = R.bit_length() - 1


def _layernorm(x, gamma, beta):
    mu = jnp.mean(x, axis=-1, keepdims=True)
    var = jnp.mean(jnp.square(x - mu), axis=-1, keepdims=True)
    return (x - mu) * jax.lax.rsqrt(var + EPS) * gamma + beta


def _gelu_tanh(x):
    # GELU with tanh approximation (matches nn.GELU(approximate='tanh'))
    c = 0.7978845608028654  # sqrt(2/pi)
    return 0.5 * x * (1.0 + jnp.tanh(c * (x + 0.044715 * x * x * x)))


# --------------------- fused transformer-block kernel ----------------------
def fused_block_kernel(x_ref, vecs_ref, wcat_ref, wmlp_ref, out_ref):
    x = x_ref[...]                                   # (R, C)

    # ---- unpack the packed small operands (static slices, no extra DMAs) ----
    g1 = vecs_ref[0:1, :C]
    b1 = vecs_ref[1:2, :C]
    g2 = vecs_ref[2:3, :C]
    b2 = vecs_ref[3:4, :C]
    b_attn = vecs_ref[4:5, :C]
    b_mlp = vecs_ref[5:6, :C]
    b_qkv = vecs_ref[6:7, :3 * C]
    b_fc = vecs_ref[7:8, :4 * C]
    w_qkv = wcat_ref[:, :3 * C]                      # q columns pre-scaled by 1/sqrt(HD)
    w_attn = wcat_ref[:, 3 * C:4 * C]
    w_fc = wcat_ref[:, 4 * C:]
    w_mlp = wmlp_ref[...]

    # ---- LN1 + fused QKV projection ----
    h = _layernorm(x, g1, b1)
    qkv = jnp.dot(h, w_qkv, preferred_element_type=jnp.float32) + b_qkv   # (R, 3C)
    q = qkv[:, :C]
    k = qkv[:, C:2 * C]
    v = qkv[:, 2 * C:]

    # ---- causal multi-head attention via block-diagonal K^T / V -------------
    # Score-column index: idx = head * R + key_row. Head outputs land directly
    # in (R, C) layout, so no per-head slicing, stacking or scatter is needed.
    # head-of-embedding-channel vs head-of-score-column masks (trace-time iota).
    row_c = jax.lax.broadcasted_iota(jnp.int32, (C, NCOL), 0)    # channel c
    col_i = jax.lax.broadcasted_iota(jnp.int32, (C, NCOL), 1)    # score col idx
    mask_k = (jnp.right_shift(row_c, LOG2_HD) ==
              jnp.right_shift(col_i, LOG2_R)).astype(jnp.float32)          # (C, NCOL)
    row_i = jax.lax.broadcasted_iota(jnp.int32, (NCOL, C), 0)    # score col idx
    col_c = jax.lax.broadcasted_iota(jnp.int32, (NCOL, C), 1)    # channel c
    mask_v = (jnp.right_shift(row_i, LOG2_R) ==
              jnp.right_shift(col_c, LOG2_HD)).astype(jnp.float32)         # (NCOL, C)

    # allowed[q_row, idx]: same batch element AND causal (key pos <= query pos)
    rq = jax.lax.broadcasted_iota(jnp.int32, (R, NCOL), 0)
    ci = jax.lax.broadcasted_iota(jnp.int32, (R, NCOL), 1)
    rk = jnp.bitwise_and(ci, R - 1)                               # key row = idx % R
    same_batch = jnp.right_shift(rk, LOG2_T) == jnp.right_shift(rq, LOG2_T)
    causal = jnp.bitwise_and(rk, T - 1) <= jnp.bitwise_and(rq, T - 1)
    allowed = jnp.logical_and(same_batch, causal)                 # (R, NCOL)

    k_bd = jnp.concatenate([k.T] * NH, axis=1) * mask_k           # (C, NCOL)
    v_bd = jnp.concatenate([v] * NH, axis=0) * mask_v             # (NCOL, C)

    s = jnp.dot(q, k_bd, preferred_element_type=jnp.float32)      # (R, NCOL)
    s = jnp.where(allowed, s, -1e30)                              # mask BEFORE max/exp
    m = jnp.max(s, axis=-1, keepdims=True)                        # per-query-row max (allowed only)
    e = jnp.exp(s - m)                                            # disallowed -> exactly 0
    y_un = jnp.dot(e, v_bd, preferred_element_type=jnp.float32)   # (R, C) unnormalized heads
    den = jnp.dot(e, mask_v, preferred_element_type=jnp.float32)  # (R, C) per-head denominators
    y = y_un / jnp.maximum(den, 1e-30)                            # exact softmax normalize

    att = jnp.dot(y, w_attn, preferred_element_type=jnp.float32) + b_attn
    x = x + att                                                   # residual 1

    # ---- LN2 + MLP ----
    h = _layernorm(x, g2, b2)
    h = jnp.dot(h, w_fc, preferred_element_type=jnp.float32) + b_fc        # (R, 4C)
    h = _gelu_tanh(h)
    h = jnp.dot(h, w_mlp, preferred_element_type=jnp.float32) + b_mlp      # (R, C)
    out_ref[...] = x + h                                          # residual 2


# ------------------------------ wrapper ------------------------------------
@jax.jit
def block_forward(x, vecs, wcat, wmlp):
    x2d = x.reshape(R, C)
    vmem = pl.BlockSpec(memory_space=pltpu.MemorySpace.VMEM)
    out2d = pl.pallas_call(
        fused_block_kernel,
        out_shape=jax.ShapeDtypeStruct((R, C), jnp.float32),
        in_specs=[vmem, vmem, vmem, vmem],
        out_specs=vmem,
        input_output_aliases={0: 0},   # residual update reuses the input buffer
    )(x2d, vecs, wcat, wmlp)
    return out2d.reshape(B, T, C)


def prepare_kernel_operands(p):
    """Host-side, one-time packing:
       - fold 1/sqrt(HD) into the q columns of the QKV projection,
       - pack the eight 1-row LN/bias vectors into one (8, 4C) array,
       - pack the three (C, *) weight matrices into one (C, 8C) array."""
    scale = 1.0 / math.sqrt(HD)
    w_qkv = p["w_qkv"].at[:, :C].multiply(scale)
    b_qkv = p["b_qkv"].at[:, :C].multiply(scale)

    vecs = jnp.zeros((8, 4 * C), jnp.float32)
    vecs = vecs.at[0, :C].set(p["ln1_g"][0])
    vecs = vecs.at[1, :C].set(p["ln1_b"][0])
    vecs = vecs.at[2, :C].set(p["ln2_g"][0])
    vecs = vecs.at[3, :C].set(p["ln2_b"][0])
    vecs = vecs.at[4, :C].set(p["b_attn_proj"][0])
    vecs = vecs.at[5, :C].set(p["b_mlp_proj"][0])
    vecs = vecs.at[6, :3 * C].set(b_qkv[0])
    vecs = vecs.at[7, :4 * C].set(p["b_fc"][0])

    wcat = jnp.concatenate([w_qkv, p["w_attn_proj"], p["w_fc"]], axis=1)  # (C, 8C)
    return vecs, wcat, p["w_mlp_proj"]


# --------------------------- pure-JAX reference ------------------------------
def block_reference(x, p):
    def ln(v, g, b):
        mu = jnp.mean(v, axis=-1, keepdims=True)
        var = jnp.mean(jnp.square(v - mu), axis=-1, keepdims=True)
        return (v - mu) / jnp.sqrt(var + EPS) * g + b

    # attention
    h = ln(x, p["ln1_g"][0], p["ln1_b"][0])
    qkv = h @ p["w_qkv"] + p["b_qkv"][0]                   # (B,T,3C)
    q, k, v = jnp.split(qkv, 3, axis=-1)
    q = q.reshape(B, T, NH, HD).transpose(0, 2, 1, 3)
    k = k.reshape(B, T, NH, HD).transpose(0, 2, 1, 3)
    v = v.reshape(B, T, NH, HD).transpose(0, 2, 1, 3)
    s = jnp.einsum("bhqd,bhkd->bhqk", q, k) / math.sqrt(HD)
    mask = jnp.tril(jnp.ones((T, T), bool))
    s = jnp.where(mask, s, -jnp.inf)
    a = jax.nn.softmax(s, axis=-1)
    y = jnp.einsum("bhqk,bhkd->bhqd", a, v).transpose(0, 2, 1, 3).reshape(B, T, C)
    y = y @ p["w_attn_proj"] + p["b_attn_proj"][0]
    x = x + y

    # mlp
    h = ln(x, p["ln2_g"][0], p["ln2_b"][0])
    h = h @ p["w_fc"] + p["b_fc"][0]
    h = _gelu_tanh(h)
    h = h @ p["w_mlp_proj"] + p["b_mlp_proj"][0]
    return x + h


# ------------------------------- main ----------------------------------------
if __name__ == "__main__":
    keys = jax.random.split(jax.random.PRNGKey(0), 9)

    params = {
        # LayerNorm params
        "ln1_g": jnp.ones((1, C), jnp.float32),
        "ln1_b": jnp.zeros((1, C), jnp.float32),
        "ln2_g": jnp.ones((1, C), jnp.float32),
        "ln2_b": jnp.zeros((1, C), jnp.float32),
        # attention (weights stored as (in, out), i.e. PyTorch W.T)
        "w_qkv": 0.02 * jax.random.normal(keys[0], (C, 3 * C), jnp.float32),
        "b_qkv": 0.01 * jax.random.normal(keys[1], (1, 3 * C), jnp.float32),
        "w_attn_proj": 0.02 * jax.random.normal(keys[2], (C, C), jnp.float32),
        "b_attn_proj": 0.01 * jax.random.normal(keys[3], (1, C), jnp.float32),
        # MLP
        "w_fc": 0.02 * jax.random.normal(keys[4], (C, 4 * C), jnp.float32),
        "b_fc": 0.01 * jax.random.normal(keys[5], (1, 4 * C), jnp.float32),
        "w_mlp_proj": 0.02 * jax.random.normal(keys[6], (4 * C, C), jnp.float32),
        "b_mlp_proj": 0.01 * jax.random.normal(keys[7], (1, C), jnp.float32),
    }

    x = jax.random.normal(keys[8], (B, T, C), jnp.float32)

    ref = block_reference(x, params)                       # unscaled params
    vecs, wcat, wmlp = prepare_kernel_operands(params)     # packed + q-scale folded

    out = block_forward(x, vecs, wcat, wmlp)
    out = jax.block_until_ready(out)

    assert out.shape == (B, T, C)
    assert jnp.allclose(out, ref, atol=1e-4, rtol=1e-4), (
        f"max abs err = {jnp.max(jnp.abs(out - ref))}")

    print("KERNEL_OK")
</pallas_src>

<mosaic_0001>
module attributes {stable_mosaic.version = 11 : i64} {
  func.func @fused_block_kernel(%arg0: memref<16x32xf32, #tpu.memory_space<vmem>>, %arg1: memref<8x128xf32, #tpu.memory_space<vmem>>, %arg2: memref<32x256xf32, #tpu.memory_space<vmem>>, %arg3: memref<128x32xf32, #tpu.memory_space<vmem>>, %arg4: memref<16x32xf32, #tpu.memory_space<vmem>>) attributes {dimension_semantics = [], scalar_prefetch = 0 : i64, scratch_operands = 0 : i64, tpu.core_type = #tpu.core_type<tc>} {
    %c0 = arith.constant 0 : index
    %c0_0 = arith.constant 0 : index
    %0 = vector.load %arg0[%c0, %c0_0] : memref<16x32xf32, #tpu.memory_space<vmem>>, vector<16x32xf32>
    %c0_1 = arith.constant 0 : index
    %c0_2 = arith.constant 0 : index
    %1 = vector.load %arg1[%c0_1, %c0_2] : memref<8x128xf32, #tpu.memory_space<vmem>>, vector<1x32xf32>
    %c1 = arith.constant 1 : index
    %c0_3 = arith.constant 0 : index
    %2 = vector.load %arg1[%c1, %c0_3] : memref<8x128xf32, #tpu.memory_space<vmem>>, vector<1x32xf32>
    %c2 = arith.constant 2 : index
    %c0_4 = arith.constant 0 : index
    %3 = vector.load %arg1[%c2, %c0_4] : memref<8x128xf32, #tpu.memory_space<vmem>>, vector<1x32xf32>
    %c3 = arith.constant 3 : index
    %c0_5 = arith.constant 0 : index
    %4 = vector.load %arg1[%c3, %c0_5] : memref<8x128xf32, #tpu.memory_space<vmem>>, vector<1x32xf32>
    %c4 = arith.constant 4 : index
    %c0_6 = arith.constant 0 : index
    %5 = vector.load %arg1[%c4, %c0_6] : memref<8x128xf32, #tpu.memory_space<vmem>>, vector<1x32xf32>
    %c5 = arith.constant 5 : index
    %c0_7 = arith.constant 0 : index
    %6 = vector.load %arg1[%c5, %c0_7] : memref<8x128xf32, #tpu.memory_space<vmem>>, vector<1x32xf32>
    %c6 = arith.constant 6 : index
    %c0_8 = arith.constant 0 : index
    %7 = vector.load %arg1[%c6, %c0_8] : memref<8x128xf32, #tpu.memory_space<vmem>>, vector<1x96xf32>
    %c7 = arith.constant 7 : index
    %c0_9 = arith.constant 0 : index
    %8 = vector.load %arg1[%c7, %c0_9] : memref<8x128xf32, #tpu.memory_space<vmem>>, vector<1x128xf32>
    %c0_10 = arith.constant 0 : index
    %c0_11 = arith.constant 0 : index
    %9 = vector.load %arg2[%c0_10, %c0_11] : memref<32x256xf32, #tpu.memory_space<vmem>>, vector<32x96xf32>
    %c0_12 = arith.constant 0 : index
    %c96 = arith.constant 96 : index
    %10 = vector.load %arg2[%c0_12, %c96] : memref<32x256xf32, #tpu.memory_space<vmem>>, vector<32x32xf32>
    %c0_13 = arith.constant 0 : index
    %c128 = arith.constant 128 : index
    %11 = vector.load %arg2[%c0_13, %c128] : memref<32x256xf32, #tpu.memory_space<vmem>>, vector<32x128xf32>
    %c0_14 = arith.constant 0 : index
    %c0_15 = arith.constant 0 : index
    %12 = vector.load %arg3[%c0_14, %c0_15] : memref<128x32xf32, #tpu.memory_space<vmem>>, vector<128x32xf32>
    %cst = arith.constant dense<0.000000e+00> : vector<16xf32>
    %13 = vector.multi_reduction <add>, %0, %cst [1] : vector<16x32xf32> to vector<16xf32>
    %14 = vector.shape_cast %13 : vector<16xf32> to vector<16x1xf32>
    %cst_16 = arith.constant 3.200000e+01 : f32
    %15 = vector.broadcast %cst_16 : f32 to vector<16x1xf32>
    %16 = arith.divf %14, %15 : vector<16x1xf32>
    %17 = vector.broadcast %16 : vector<16x1xf32> to vector<16x32xf32>
    %18 = arith.subf %0, %17 : vector<16x32xf32>
    %19 = arith.mulf %18, %18 : vector<16x32xf32>
    %cst_17 = arith.constant dense<0.000000e+00> : vector<16xf32>
    %20 = vector.multi_reduction <add>, %19, %cst_17 [1] : vector<16x32xf32> to vector<16xf32>
    %21 = vector.shape_cast %20 : vector<16xf32> to vector<16x1xf32>
    %cst_18 = arith.constant 3.200000e+01 : f32
    %22 = vector.broadcast %cst_18 : f32 to vector<16x1xf32>
    %23 = arith.divf %21, %22 : vector<16x1xf32>
    %24 = vector.broadcast %16 : vector<16x1xf32> to vector<16x32xf32>
    %25 = arith.subf %0, %24 : vector<16x32xf32>
    %cst_19 = arith.constant 9.99999974E-6 : f32
    %26 = vector.broadcast %cst_19 : f32 to vector<16x1xf32>
    %27 = arith.addf %23, %26 : vector<16x1xf32>
    %28 = math.rsqrt %27 : vector<16x1xf32>
    %29 = vector.broadcast %28 : vector<16x1xf32> to vector<16x32xf32>
    %30 = arith.mulf %25, %29 : vector<16x32xf32>
    %31 = vector.broadcast %1 : vector<1x32xf32> to vector<16x32xf32>
    %32 = arith.mulf %30, %31 : vector<16x32xf32>
    %33 = vector.broadcast %2 : vector<1x32xf32> to vector<16x32xf32>
    %34 = arith.addf %32, %33 : vector<16x32xf32>
    %cst_20 = arith.constant dense<0.000000e+00> : vector<16x96xf32>
    %35 = tpu.matmul %34, %9, %cst_20 {dimension_numbers = #tpu.dot_dimension_numbers<[1], [0], [0], [1], [0, 0, 1, 1], [], []>} : vector<16x32xf32>, vector<32x96xf32>, vector<16x96xf32> -> vector<16x96xf32>
    %36 = vector.broadcast %7 : vector<1x96xf32> to vector<16x96xf32>
    %37 = arith.addf %35, %36 : vector<16x96xf32>
    %38 = vector.extract_strided_slice %37 {offsets = [0, 0], sizes = [16, 32], strides = [1, 1]} : vector<16x96xf32> to vector<16x32xf32>
    %39 = vector.extract_strided_slice %37 {offsets = [0, 32], sizes = [16, 32], strides = [1, 1]} : vector<16x96xf32> to vector<16x32xf32>
    %40 = vector.extract_strided_slice %37 {offsets = [0, 64], sizes = [16, 32], strides = [1, 1]} : vector<16x96xf32> to vector<16x32xf32>
    %41 = tpu.iota {dimensions = array<i32: 0>} : vector<32x64xi32>
    %42 = tpu.iota {dimensions = array<i32: 1>} : vector<32x64xi32>
    %c3_i32 = arith.constant 3 : i32
    %43 = vector.broadcast %c3_i32 : i32 to vector<32x64xi32>
    %44 = arith.shrsi %41, %43 : vector<32x64xi32>
    %c4_i32 = arith.constant 4 : i32
    %45 = vector.broadcast %c4_i32 : i32 to vector<32x64xi32>
    %46 = arith.shrsi %42, %45 : vector<32x64xi32>
    %47 = arith.cmpi eq, %44, %46 : vector<32x64xi32>
    %48 = arith.extui %47 : vector<32x64xi1> to vector<32x64xi32>
    %49 = arith.sitofp %48 : vector<32x64xi32> to vector<32x64xf32>
    %50 = tpu.iota {dimensions = array<i32: 0>} : vector<64x32xi32>
    %51 = tpu.iota {dimensions = array<i32: 1>} : vector<64x32xi32>
    %c4_i32_21 = arith.constant 4 : i32
    %52 = vector.broadcast %c4_i32_21 : i32 to vector<64x32xi32>
    %53 = arith.shrsi %50, %52 : vector<64x32xi32>
    %c3_i32_22 = arith.constant 3 : i32
    %54 = vector.broadcast %c3_i32_22 : i32 to vector<64x32xi32>
    %55 = arith.shrsi %51, %54 : vector<64x32xi32>
    %56 = arith.cmpi eq, %53, %55 : vector<64x32xi32>
    %57 = arith.extui %56 : vector<64x32xi1> to vector<64x32xi32>
    %58 = arith.sitofp %57 : vector<64x32xi32> to vector<64x32xf32>
    %59 = tpu.iota {dimensions = array<i32: 0>} : vector<16x64xi32>
    %60 = tpu.iota {dimensions = array<i32: 1>} : vector<16x64xi32>
    %c15_i32 = arith.constant 15 : i32
    %61 = vector.broadcast %c15_i32 : i32 to vector<16x64xi32>
    %62 = arith.andi %60, %61 : vector<16x64xi32>
    %c3_i32_23 = arith.constant 3 : i32
    %63 = vector.broadcast %c3_i32_23 : i32 to vector<16x64xi32>
    %64 = arith.shrsi %62, %63 : vector<16x64xi32>
    %c3_i32_24 = arith.constant 3 : i32
    %65 = vector.broadcast %c3_i32_24 : i32 to vector<16x64xi32>
    %66 = arith.shrsi %59, %65 : vector<16x64xi32>
    %67 = arith.cmpi eq, %64, %66 : vector<16x64xi32>
    %c7_i32 = arith.constant 7 : i32
    %68 = vector.broadcast %c7_i32 : i32 to vector<16x64xi32>
    %69 = arith.andi %62, %68 : vector<16x64xi32>
    %c7_i32_25 = arith.constant 7 : i32
    %70 = vector.broadcast %c7_i32_25 : i32 to vector<16x64xi32>
    %71 = arith.andi %59, %70 : vector<16x64xi32>
    %72 = arith.cmpi sle, %69, %71 : vector<16x64xi32>
    %73 = arith.andi %67, %72 : vector<16x64xi1>
    %74 = tpu.transpose %39, [1, 0] : vector<16x32xf32> -> vector<32x16xf32>
    %75 = tpu.concatenate %74, %74, %74, %74 in 1 : vector<32x16xf32>, vector<32x16xf32>, vector<32x16xf32>, vector<32x16xf32> -> vector<32x64xf32>
    %76 = arith.mulf %75, %49 : vector<32x64xf32>
    %77 = tpu.concatenate %40, %40, %40, %40 in 0 : vector<16x32xf32>, vector<16x32xf32>, vector<16x32xf32>, vector<16x32xf32> -> vector<64x32xf32>
    %78 = arith.mulf %77, %58 : vector<64x32xf32>
    %cst_26 = arith.constant dense<0.000000e+00> : vector<16x64xf32>
    %79 = tpu.matmul %38, %76, %cst_26 {dimension_numbers = #tpu.dot_dimension_numbers<[1], [0], [0], [1], [0, 0, 1, 1], [], []>} : vector<16x32xf32>, vector<32x64xf32>, vector<16x64xf32> -> vector<16x64xf32>
    %cst_27 = arith.constant -1.000000e+30 : f32
    %80 = vector.broadcast %cst_27 : f32 to vector<16x64xf32>
    %81 = arith.select %73, %79, %80 : vector<16x64xi1>, vector<16x64xf32>
    %cst_28 = arith.constant dense<0xFF800000> : vector<16xf32>
    %82 = vector.multi_reduction <maximumf>, %81, %cst_28 [1] : vector<16x64xf32> to vector<16xf32>
    %83 = vector.shape_cast %82 : vector<16xf32> to vector<16x1xf32>
    %84 = vector.broadcast %83 : vector<16x1xf32> to vector<16x64xf32>
    %85 = arith.subf %81, %84 : vector<16x64xf32>
    %86 = math.exp %85 : vector<16x64xf32>
    %cst_29 = arith.constant dense<0.000000e+00> : vector<16x32xf32>
    %87 = tpu.matmul %86, %78, %cst_29 {dimension_numbers = #tpu.dot_dimension_numbers<[1], [0], [0], [1], [0, 0, 1, 1], [], []>} : vector<16x64xf32>, vector<64x32xf32>, vector<16x32xf32> -> vector<16x32xf32>
    %cst_30 = arith.constant dense<0.000000e+00> : vector<16x32xf32>
    %88 = tpu.matmul %86, %58, %cst_30 {dimension_numbers = #tpu.dot_dimension_numbers<[1], [0], [0], [1], [0, 0, 1, 1], [], []>} : vector<16x64xf32>, vector<64x32xf32>, vector<16x32xf32> -> vector<16x32xf32>
    %cst_31 = arith.constant 1.000000e-30 : f32
    %89 = vector.broadcast %cst_31 : f32 to vector<16x32xf32>
    %90 = arith.maximumf %88, %89 : vector<16x32xf32>
    %91 = arith.divf %87, %90 : vector<16x32xf32>
    %cst_32 = arith.constant dense<0.000000e+00> : vector<16x32xf32>
    %92 = tpu.matmul %91, %10, %cst_32 {dimension_numbers = #tpu.dot_dimension_numbers<[1], [0], [0], [1], [0, 0, 1, 1], [], []>} : vector<16x32xf32>, vector<32x32xf32>, vector<16x32xf32> -> vector<16x32xf32>
    %93 = vector.broadcast %5 : vector<1x32xf32> to vector<16x32xf32>
    %94 = arith.addf %92, %93 : vector<16x32xf32>
    %95 = arith.addf %0, %94 : vector<16x32xf32>
    %cst_33 = arith.constant dense<0.000000e+00> : vector<16xf32>
    %96 = vector.multi_reduction <add>, %95, %cst_33 [1] : vector<16x32xf32> to vector<16xf32>
    %97 = vector.shape_cast %96 : vector<16xf32> to vector<16x1xf32>
    %cst_34 = arith.constant 3.200000e+01 : f32
    %98 = vector.broadcast %cst_34 : f32 to vector<16x1xf32>
    %99 = arith.divf %97, %98 : vector<16x1xf32>
    %100 = vector.broadcast %99 : vector<16x1xf32> to vector<16x32xf32>
    %101 = arith.subf %95, %100 : vector<16x32xf32>
    %102 = arith.mulf %101, %101 : vector<16x32xf32>
    %cst_35 = arith.constant dense<0.000000e+00> : vector<16xf32>
    %103 = vector.multi_reduction <add>, %102, %cst_35 [1] : vector<16x32xf32> to vector<16xf32>
    %104 = vector.shape_cast %103 : vector<16xf32> to vector<16x1xf32>
    %cst_36 = arith.constant 3.200000e+01 : f32
    %105 = vector.broadcast %cst_36 : f32 to vector<16x1xf32>
    %106 = arith.divf %104, %105 : vector<16x1xf32>
    %107 = vector.broadcast %99 : vector<16x1xf32> to vector<16x32xf32>
    %108 = arith.subf %95, %107 : vector<16x32xf32>
    %cst_37 = arith.constant 9.99999974E-6 : f32
    %109 = vector.broadcast %cst_37 : f32 to vector<16x1xf32>
    %110 = arith.addf %106, %109 : vector<16x1xf32>
    %111 = math.rsqrt %110 : vector<16x1xf32>
    %112 = vector.broadcast %111 : vector<16x1xf32> to vector<16x32xf32>
    %113 = arith.mulf %108, %112 : vector<16x32xf32>
    %114 = vector.broadcast %3 : vector<1x32xf32> to vector<16x32xf32>
    %115 = arith.mulf %113, %114 : vector<16x32xf32>
    %116 = vector.broadcast %4 : vector<1x32xf32> to vector<16x32xf32>
    %117 = arith.addf %115, %116 : vector<16x32xf32>
    %cst_38 = arith.constant dense<0.000000e+00> : vector<16x128xf32>
    %118 = tpu.matmul %117, %11, %cst_38 {dimension_numbers = #tpu.dot_dimension_numbers<[1], [0], [0], [1], [0, 0, 1, 1], [], []>} : vector<16x32xf32>, vector<32x128xf32>, vector<16x128xf32> -> vector<16x128xf32>
    %119 = vector.broadcast %8 : vector<1x128xf32> to vector<16x128xf32>
    %120 = arith.addf %118, %119 : vector<16x128xf32>
    %cst_39 = arith.constant 5.000000e-01 : f32
    %121 = vector.broadcast %cst_39 : f32 to vector<16x128xf32>
    %122 = arith.mulf %121, %120 : vector<16x128xf32>
    %cst_40 = arith.constant 4.471500e-02 : f32
    %123 = vector.broadcast %cst_40 : f32 to vector<16x128xf32>
    %124 = arith.mulf %123, %120 : vector<16x128xf32>
    %125 = arith.mulf %124, %120 : vector<16x128xf32>
    %126 = arith.mulf %125, %120 : vector<16x128xf32>
    %127 = arith.addf %120, %126 : vector<16x128xf32>
    %cst_41 = arith.constant 0.797884583 : f32
    %128 = vector.broadcast %cst_41 : f32 to vector<16x128xf32>
    %129 = arith.mulf %128, %127 : vector<16x128xf32>
    %130 = math.tanh %129 : vector<16x128xf32>
    %cst_42 = arith.constant 1.000000e+00 : f32
    %131 = vector.broadcast %cst_42 : f32 to vector<16x128xf32>
    %132 = arith.addf %131, %130 : vector<16x128xf32>
    %133 = arith.mulf %122, %132 : vector<16x128xf32>
    %cst_43 = arith.constant dense<0.000000e+00> : vector<16x32xf32>
    %134 = tpu.matmul %133, %12, %cst_43 {dimension_numbers = #tpu.dot_dimension_numbers<[1], [0], [0], [1], [0, 0, 1, 1], [], []>} : vector<16x128xf32>, vector<128x32xf32>, vector<16x32xf32> -> vector<16x32xf32>
    %135 = vector.broadcast %6 : vector<1x32xf32> to vector<16x32xf32>
    %136 = arith.addf %134, %135 : vector<16x32xf32>
    %137 = arith.addf %95, %136 : vector<16x32xf32>
    %c0_44 = arith.constant 0 : index
    %c0_45 = arith.constant 0 : index
    %138 = vector.load %arg4[%c0_44, %c0_45] : memref<16x32xf32, #tpu.memory_space<vmem>>, vector<16x32xf32>
    tpu.vector_store %arg4[%c0_44, %c0_45], %137 {strides = array<i32>} : memref<16x32xf32, #tpu.memory_space<vmem>>, vector<16x32xf32>,
    return
  }
}

</mosaic_0001>

<bundles_post_ra>
// kernel: block_forward.1
= control target key start
LH: loop header
LB: loop body
LE: loop exit
PB: predicated region body
PF: predicated region fallthrough
CT: control target
= control target key end

     0   :  { %vm51_vm0 = vcmask 261120   ;;  %v805_v4 = vmov 32.0   ;;  %s806_s6 = smov 96   ;;  %s807_s7 = smov 48   ;;  %s1194_s0 = inlined_call_operand.vmem [shape: f32[16,32], index: 0, kind: input, shape index: {}, may-alias: {0,4}]   ;;  %s1195_s1 = inlined_call_operand.vmem [shape: f32[8,128], index: 1, kind: input, shape index: {}]   ;;  %s1196_s2 = inlined_call_operand.vmem [shape: f32[32,256], index: 2, kind: input, shape index: {}]   ;;  %s1197_s3 = inlined_call_operand.vmem [shape: f32[128,32], index: 3, kind: input, shape index: {}]   ;;  %s1198_s4 = inlined_call_operand.vmem [shape: f32[16,32], index: 4, kind: output, shape index: {}, may-alias: {0,4}]  }
   0x1   :  { %v841_v0 = vld [vmem:[%s1194_s0] sm:$0xff]  ;;  %v848_v2 = vld [vmem:[%s1194_s0 + $0x8] sm:$0xff]  ;;  %783 = vrcp.f32 %v805_v4  ;;  %v863_v21 = vld [vmem:[%s1196_s2 + $0x30] sm:$0xff]  ;;  %s808_s8 = smov 16   ;;  %s809_s9 = smov 32  }
   0x2   :  { %v52_v1 = vsel %vm51_vm0, %v841_v0, 0.0  ;;  %v55_v3 = vsel %vm51_vm0, %v848_v2, 0.0  ;;  %128 = vmatpush.msra.mxu0 %v863_v21  ;;  %v869_v22 = vld [vmem:[%s1196_s2 + $0x20] sm:$0xff]  ;;  %v875_v23 = vld [vmem:[%s1196_s2 + $0x10] sm:$0xff]  ;;  %s811_s10 = smov 64  }
   0x3   :  { %53 = vadd.xlane.f32.xlu0 %v52_v1  ;;  %v881_v24 = vld [vmem:[%s1196_s2] sm:$0xff]  ;;  %v765_v25 = vpack.i.bf16 %v869_v22, %v863_v21  ;;  %v139_v1 = vlaneseq }
   0x4   :  { %129 = vmatpush.msra.mxu0 %v869_v22  ;;  %v770_v26 = vpack.i.bf16 %v881_v24, %v875_v23  ;;  %v775_v41 = vld [vmem:[%s1195_s1] ss:$0 sm:$0xff]  ;;  %v776_v45 = vld [vmem:[%s1195_s1 + $0x1] ss:$0 sm:$0xff]  ;;  %v777_v55 = vld [vmem:[%s1195_s1 + $0x6] ss:$0 sm:$0xff] }
   0x5   :  { %v920_v4 = vshrl.u32 %v139_v1, 7 }
   0x6   :  { %130 = vmatpush.msra.mxu0 %v875_v23  ;;  %v812_v23 = vmov 1.0  }
   0x7   :  { %v784_v5 = vpop.eup %783 }
   0x8   :  { %v59_v6 = vmul.f32 32.0, %v784_v5  ;;  %vm63_vm1 = vweird.f32 %v784_v5  ;;  %131 = vmatpush.msra.mxu0 %v881_v24 }
   0xa   :  { %v60_v7 = vsub.f32 1.0, %v59_v6  ;;  %v165_v6 = vadd.s32 48, %v920_v4 }
   0xb   :  { %56 = vadd.xlane.f32.xlu0 %v55_v3 }
   0xc   :  { %v61_v8 = vmul.f32 %v784_v5, %v60_v7  ;;  %v166_v7 = vadd.s32 56, %v920_v4 }
   0xe   :  { %v62_v9 = vadd.f32 %v784_v5, %v61_v8 }
  0x10   :  { %v852_v10 = vsel %vm63_vm1, %v784_v5, %v62_v9  ;;  %v922_v5 = vand.u32 127, %v139_v1  ;;  %v173_v9 = vshra.s32 %v165_v6, 4 }
  0x76   :  { %v54_v11 = vpop.xlane.xlu0 %53 }
  0x77   :  { %v65_v12 = vmul.f32 %v852_v10, %v54_v11  ;;  %v174_v11 = vshra.s32 %v166_v7, 4 }
  0x79   :  { %v67_v13 = vsub.f32 %v841_v0, %v65_v12  ;;  %v175_v12 = vshra.s32 %v922_v5, 3 }
  0x7b   :  { %v69_v14 = vmul.f32 %v67_v13, %v67_v13  ;;  %vm932_vm8 = vcmp.eq.s32.totalorder %v173_v9, %v175_v12  ;;  %vm936_vm9 = vcmp.eq.s32.totalorder %v174_v11, %v175_v12 }
  0x7d   :  { %v71_v15 = vsel %vm51_vm0, %v69_v14, 0.0 }
  0x7e   :  { %72 = vadd.xlane.f32.xlu1 %v71_v15  ;;  %v57_v16 = vpop.xlane.xlu0 %56  ;;  %v142_v15 = vadd.s32 16, %v920_v4 }
  0x7f   :  { %v66_v17 = vmul.f32 %v852_v10, %v57_v16  ;;  %v143_v16 = vadd.s32 24, %v920_v4 }
  0x80   :  { %v148_v1 = vshra.s32 %v142_v15, 3 }
  0x81   :  { %v68_v18 = vsub.f32 %v848_v2, %v66_v17  ;;  %v810_v17 = vmov 0.0  }
  0x83   :  { %v70_v19 = vmul.f32 %v68_v18, %v68_v18 }
  0x85   :  { %v74_v20 = vsel %vm51_vm0, %v70_v19, 0.0  ;;  %v698_v19 = vsel %vm936_vm9, 1.0, %v810_v17 }
  0x86   :  { %75 = vadd.xlane.f32.xlu1 %v74_v20  ;;  %v169_v20 = vshra.s32 %v142_v15, 4 }
  0x88   :  { %vm952_vm10 = vcmp.eq.s32.totalorder %v169_v20, %v175_v12 }
  0xf1   :  { %v73_v27 = vpop.xlane.xlu1 %72 }
  0xf2   :  { %v77_v28 = vmul.f32 %v73_v27, %v852_v10  ;;  %v170_v27 = vshra.s32 %v143_v16, 4 }
  0xf4   :  { %v79_v29 = vadd.f32 1e-05, %v77_v28  ;;  %vm956_vm11 = vcmp.eq.s32.totalorder %v170_v27, %v175_v12 }
  0xf6   :  { %785 = vrsqrt.f32 %v79_v29  ;;  %vm87_vm3 = vweird.f32 %v79_v29 }
  0xf9   :  { %v76_v30 = vpop.xlane.xlu1 %75 }
  0xfa   :  { %v78_v31 = vmul.f32 %v76_v30, %v852_v10 }
  0xfc   :  { %v786_v32 = vpop.eup %785  ;;  %v80_v33 = vadd.f32 1e-05, %v78_v31  ;;  %v693_v31 = vsel %vm952_vm10, 1.0, %v810_v17 }
  0xfd   :  { %v82_v34 = vmul.f32 %v786_v32, %v79_v29  ;;  %vm88_vm2 = vweird.f32 %v786_v32 }
  0xfe   :  { %787 = vrsqrt.f32 %v80_v33  ;;  %vm89_vm4 = vmor %vm87_vm3, %vm88_vm2  ;;  %vm97_vm6 = vweird.f32 %v80_v33  ;;  %vm291_vm2 = vcmask 130048   ;;  %vm300_vm3 = vcmask 392192  }
  0xff   :  { %v83_v35 = vmul.f32 %v786_v32, %v82_v34  ;;  %v163_v34 = vadd.s32 32, %v920_v4 }
 0x101   :  { %v84_v36 = vmul.f32 0.5, %v83_v35  ;;  %v164_v35 = vadd.s32 40, %v920_v4 }
 0x103   :  { %v85_v37 = vsub.f32 1.5, %v84_v36  ;;  %v171_v36 = vshra.s32 %v163_v34, 4 }
 0x104   :  { %v788_v38 = vpop.eup %787 }
 0x105   :  { %v86_v39 = vmul.f32 %v786_v32, %v85_v37  ;;  %v92_v40 = vmul.f32 %v788_v38, %v80_v33  ;;  %vm98_vm5 = vweird.f32 %v788_v38  ;;  %v172_v37 = vshra.s32 %v164_v35, 4 }
 0x106   :  { %vm99_vm7 = vmor %vm97_vm6, %vm98_vm5  ;;  %vm974_vm12 = vcmp.eq.s32.totalorder %v171_v36, %v175_v12 }
 0x107   :  { %v90_v42 = vsel %vm89_vm4, %v786_v32, %v86_v39  ;;  %v93_v43 = vmul.f32 %v788_v38, %v92_v40  ;;  %v694_v32 = vsel %vm956_vm11, 1.0, %v810_v17  ;;  %vm978_vm13 = vcmp.eq.s32.totalorder %v172_v37, %v175_v12 }
 0x108   :  { %v101_v44 = vmul.f32 %v90_v42, %v67_v13  ;;  %v735_v33 = vpack.i.bf16 %v693_v31, %v694_v32  ;;  %v983_v40 = vadd.s32 8, %v920_v4  ;;  %v696_v42 = vsel %vm978_vm13, 1.0, %v810_v17 }
 0x109   :  { %v94_v46 = vmul.f32 0.5, %v93_v43  ;;  %v167_v43 = vshra.s32 %v920_v4, 4 }
 0x10a   :  { %v104_v47 = vmul.f32 %v775_v41, %v101_v44  ;;  %v168_v44 = vshra.s32 %v983_v40, 4  ;;  %v147_v9 = vshra.s32 %v983_v40, 3 }
 0x10b   :  { %v95_v48 = vsub.f32 1.5, %v94_v46  ;;  %vm995_vm14 = vcmp.eq.s32.totalorder %v167_v43, %v175_v12 }
 0x10c   :  { %v107_v49 = vadd.f32 %v776_v45, %v104_v47  ;;  %vm999_vm15 = vcmp.eq.s32.totalorder %v168_v44, %v175_v12 }
 0x10d   :  { %v96_v50 = vmul.f32 %v788_v38, %v95_v48  ;;  %v691_v48 = vsel %vm995_vm14, 1.0, %v810_v17 }
 0x10e   :  { %685 = vmatmul.msk.f32.vlgmr.msra.gmra.mxu0 %vm51_vm0, %v107_v49  ;;  %v692_v49 = vsel %vm999_vm15, 1.0, %v810_v17 }
 0x10f   :  { %v100_v51 = vsel %vm99_vm7, %v788_v38, %v96_v50  ;;  %v740_v50 = vpack.i.bf16 %v691_v48, %v692_v49 }
 0x110   :  { %v102_v52 = vmul.f32 %v100_v51, %v68_v18  ;;  %v697_v18 = vsel %vm932_vm8, 1.0, %v810_v17 }
 0x111   :  { %v725_v28 = vpack.i.bf16 %v697_v18, %v698_v19 }
 0x112   :  { %v105_v53 = vmul.f32 %v775_v41, %v102_v52  ;;  %v695_v41 = vsel %vm974_vm12, 1.0, %v810_v17 }
 0x114   :  { %v108_v54 = vadd.f32 %v776_v45, %v105_v53  ;;  %v730_v45 = vpack.i.bf16 %v695_v41, %v696_v42 }
 0x116   :  { %686 = vmatmul.msk.f32.gmra.mxu0 %vm51_vm0, %v108_v54 }
 0x18b   :  { %v133_v56 = vpop.f32.mrf.mxu0 }
 0x18c   :  { %v901_v57 = vadd.f32 %v777_v55, %v133_v56 }
 0x18e   :  { %213 = vrot.lane.b32.xlu2 %v901_v57, %s806_s6 }
 0x193   :  { %v136_v58 = vpop.f32.mrf.mxu0 }
 0x194   :  { %v904_v59 = vadd.f32 %v777_v55, %v136_v58 }
 0x196   :  { %215 = vrot.lane.b32.xlu2 %v904_v59, %s806_s6 }
 0x1e8   :  { %v214_v60 = vpop.permute.xlu2 %213 }
 0x1e9   :  { %219 = vxpose.xlu0.b32.start [1/2] (short) (narrow) %v214_v60, 32  ;;  %v149_v60 = vshra.s32 %v143_v16, 3  ;;  %v146_v16 = vshra.s32 %v920_v4, 3 }
 0x1f0   :  { %v216_v61 = vpop.permute.xlu2 %215 }
 0x1f1   :  { %220 = vxpose.xlu0.b32.end [2/2] (short) (narrow) %v216_v61, 32  ;;  %v150_v61 = vshra.s32 %v922_v5, 4 }
 0x1f3   :  { %vm154_vm1 = vcmp.eq.s32.totalorder %v149_v60, %v150_v61  ;;  %vm153_vm4 = vcmp.eq.s32.totalorder %v148_v1, %v150_v61  ;;  %vm152_vm5 = vcmp.eq.s32.totalorder %v147_v9, %v150_v61  ;;  %vm151_vm6 = vcmp.eq.s32.totalorder %v146_v16, %v150_v61 }
 0x1f4   :  { %v690_v18 = vsel %vm154_vm1, 1.0, %v810_v17  ;;  %v688_v32 = vsel %vm152_vm5, 1.0, %v810_v17  ;;  %v687_v37 = vsel %vm151_vm6, 1.0, %v810_v17 }
 0x28d   :  { %v907_v62 = vpop.trf.xlu0 }
 0x28e   :  { %279 = vrot.lane.b32.xlu0 %v907_v62, %s807_s7  ;;  %255 = vrot.lane.b32.xlu2 %v907_v62, %s808_s8 }
 0x295   :  { %v912_v63 = vpop.trf.xlu0 }
 0x296   :  { %257 = vrot.lane.b32.xlu1 %v912_v63, %s808_s8 }
 0x29d   :  { %v915_v3 = vpop.trf.xlu0 }
 0x29e   :  { %269 = vrot.lane.b32.xlu1 %v912_v63, %s809_s9  ;;  %259 = vrot.lane.b32.xlu2 %v915_v3, %s808_s8 }
 0x2a5   :  { %v926_v8 = vpop.trf.xlu0 }
 0x2a6   :  { %271 = vrot.lane.b32.xlu2 %v915_v3, %s809_s9  ;;  %261 = vrot.lane.b32.xlu1 %v926_v8, %s808_s8 }
 0x2ae   :  { %283 = vrot.lane.b32.xlu2 %v915_v3, %s807_s7  ;;  %281 = vrot.lane.b32.xlu1 %v912_v63, %s807_s7 }
 0x2b6   :  { %273 = vrot.lane.b32.xlu2 %v926_v8, %s809_s9  ;;  %726 = vrot.lane.b32.xlu1 %v725_v28, %s811_s10  ;;  %v689_v28 = vsel %vm153_vm4, 1.0, %v810_v17 }
 0x2be   :  { %285 = vrot.lane.b32.xlu2 %v926_v8, %s807_s7  ;;  %736 = vrot.lane.b32.xlu1 %v735_v33, %s811_s10 }
 0x2c6   :  { %267 = vrot.lane.b32.xlu2 %v907_v62, %s809_s9 }
 0x2ce   :  { %731 = vrot.lane.b32.xlu2 %v730_v45, %s811_s10 }
 0x2d6   :  { %741 = vrot.lane.b32.xlu2 %v740_v50, %s811_s10 }
 0x2e8   :  { %v256_v51 = vpop.permute.xlu2 %255 }
 0x2e9   :  { %v292_v33 = vsel %vm291_vm2, %v907_v62, %v256_v51 }
 0x2f8   :  { %v260_v52 = vpop.permute.xlu2 %259 }
 0x2f9   :  { %v294_v11 = vsel %vm291_vm2, %v915_v3, %v260_v52 }
 0x300   :  { %v272_v53 = vpop.permute.xlu2 %271  ;;  %v280_v41 = vpop.permute.xlu0 %279 }
 0x301   :  { %v298_v15 = vsel %vm51_vm0, %v294_v11, %v272_v53 }
 0x308   :  { %v258_v54 = vpop.permute.xlu1 %257  ;;  %v284_v55 = vpop.permute.xlu2 %283 }
 0x309   :  { %v303_v20 = vsel %vm300_vm3, %v298_v15, %v284_v55 }
 0x30a   :  { %v307_v3 = vmul.f32 %v689_v28, %v303_v20  ;;  %v206_v28 = vand.u32 7, %v983_v40 }
 0x310   :  { %v270_v56 = vpop.permute.xlu1 %269  ;;  %v274_v58 = vpop.permute.xlu2 %273 }
 0x318   :  { %v286_v6 = vpop.permute.xlu2 %285  ;;  %v262_v7 = vpop.permute.xlu1 %261 }
 0x319   :  { %v295_v12 = vsel %vm291_vm2, %v926_v8, %v262_v7  ;;  %v293_v8 = vsel %vm291_vm2, %v912_v63, %v258_v54 }
 0x31a   :  { %v299_v19 = vsel %vm51_vm0, %v295_v12, %v274_v58  ;;  %v297_v34 = vsel %vm51_vm0, %v293_v8, %v270_v56  ;;  %v200_v12 = vand.u32 15, %v922_v5 }
 0x31b   :  { %v304_v27 = vsel %vm300_vm3, %v299_v19, %v286_v6  ;;  %v205_v19 = vand.u32 7, %v920_v4 }
 0x31c   :  { %v308_v31 = vmul.f32 %v690_v18, %v304_v27  ;;  %v201_v18 = vshra.s32 %v200_v12, 3  ;;  %v204_v15 = vand.u32 7, %v200_v12 }
 0x31e   :  { %365 = vmatpush.msra.mxu1 %v308_v31  ;;  %vm202_vm7 = vcmp.eq.s32.totalorder %v201_v18, %v146_v16  ;;  %vm207_vm1 = vcmp.le.s32.totalorder %v204_v15, %v205_v19  ;;  %vm203_vm4 = vcmp.eq.s32.totalorder %v201_v18, %v147_v9  ;;  %vm208_vm5 = vcmp.le.s32.totalorder %v204_v15, %v206_v28 }
 0x31f   :  { %vm209_vm2 = vmand %vm202_vm7, %vm207_vm1 }
 0x320   :  { %v268_v35 = vpop.permute.xlu2 %267  ;;  %366 = vmatpush.msra.mxu1 %v307_v3  ;;  %v282_v36 = vpop.permute.xlu1 %281  ;;  %vm210_vm6 = vmand %vm203_vm4, %vm208_vm5 }
 0x321   :  { %v296_v42 = vsel %vm51_vm0, %v292_v33, %v268_v35  ;;  %v302_v43 = vsel %vm300_vm3, %v297_v34, %v282_v36 }
 0x322   :  { %v306_v44 = vmul.f32 %v688_v32, %v302_v43  ;;  %v301_v63 = vsel %vm300_vm3, %v296_v42, %v280_v41  ;;  %vm378_vm3 = vcmask 523264  }
 0x323   :  { %v305_v45 = vmul.f32 %v687_v37, %v301_v63 }
 0x324   :  { %367 = vmatpush.msra.mxu1 %v306_v44 }
 0x326   :  { %368 = vmatpush.msra.mxu1 %v305_v45 }
 0x327   :  { %699 = vmatmul.msk.f32.vlgmr.msra.gmra.mxu1 %vm51_vm0, %v901_v57 }
 0x328   :  { %v727_v62 = vpop.permute.xlu1 %726  ;;  %v732_v50 = vpop.permute.xlu2 %731 }
 0x329   :  { %v729_v48 = vunpack.i.h.bf16 %v727_v62  ;;  %v728_v49 = vunpack.i.l.bf16 %v727_v62  ;;  %v734_v52 = vunpack.i.h.bf16 %v732_v50  ;;  %v733_v53 = vunpack.i.l.bf16 %v732_v50 }
 0x32b   :  { %v347_v17 = vmul.f32 %v729_v48, %v901_v57  ;;  %v348_v51 = vmul.f32 %v728_v49, %v904_v59  ;;  %v345_v55 = vmul.f32 %v734_v52, %v901_v57  ;;  %v346_v56 = vmul.f32 %v733_v53, %v904_v59 }
 0x32d   :  { %v745_v54 = vpack.i.bf16 %v347_v17, %v348_v51  ;;  %v750_v1 = vpack.i.bf16 %v345_v55, %v346_v56 }
 0x32f   :  { %700 = vmatmul.msk.f32.gmra.mxu1 %vm51_vm0, %v904_v59  ;;  %746 = vrot.lane.b32.xlu1 %v745_v54, %s811_s10 }
 0x330   :  { %v737_v58 = vpop.permute.xlu1 %736  ;;  %v742_v37 = vpop.permute.xlu2 %741 }
 0x331   :  { %v739_v60 = vunpack.i.h.bf16 %v737_v58  ;;  %v738_v61 = vunpack.i.l.bf16 %v737_v58  ;;  %v744_v43 = vunpack.i.h.bf16 %v742_v37  ;;  %v743_v40 = vunpack.i.l.bf16 %v742_v37 }
 0x333   :  { %v343_v6 = vmul.f32 %v739_v60, %v901_v57  ;;  %v344_v7 = vmul.f32 %v738_v61, %v904_v59  ;;  %v341_v9 = vmul.f32 %v744_v43, %v901_v57  ;;  %v342_v44 = vmul.f32 %v743_v40, %v904_v59 }
 0x335   :  { %v755_v11 = vpack.i.bf16 %v343_v6, %v344_v7  ;;  %v760_v63 = vpack.i.bf16 %v341_v9, %v342_v44 }
 0x337   :  { %751 = vrot.lane.b32.xlu1 %v750_v1, %s811_s10 }
 0x33f   :  { %756 = vrot.lane.b32.xlu1 %v755_v11, %s811_s10 }
 0x3a1   :  { %v747_v20 = vpop.permute.xlu1 %746 }
 0x3a2   :  { %v748_v27 = vunpack.i.l.bf16 %v747_v20  ;;  %v749_v3 = vunpack.i.h.bf16 %v747_v20 }
 0x3a4   :  { %v370_v31 = vpop.f32.mrf.mxu1  ;;  %437 = vmatpush.msra.mxu3 %v748_v27 }
 0x3a5   :  { %v376_v8 = vsel %vm209_vm2, %v370_v31, -1e+30 }
 0x3a6   :  { %438 = vmatpush.msra.mxu3 %v749_v3  ;;  %v379_v32 = vsel %vm378_vm3, %v376_v8, -inf }
 0x3a7   :  { %380 = vmax.xlane.f32.xlu2 %v379_v32 }
 0x3a9   :  { %v752_v4 = vpop.permute.xlu1 %751 }
 0x3aa   :  { %v753_v5 = vunpack.i.l.bf16 %v752_v4  ;;  %v754_v33 = vunpack.i.h.bf16 %v752_v4  ;;  %v778_v4 = vld [vmem:[%s1195_s1 + $0x4] ss:$0 sm:$0xff] }
 0x3ac   :  { %v373_v16 = vpop.f32.mrf.mxu1  ;;  %439 = vmatpush.msra.mxu3 %v753_v5 }
 0x3ad   :  { %v377_v34 = vsel %vm210_vm6, %v373_v16, -1e+30 }
 0x3ae   :  { %440 = vmatpush.msra.mxu3 %v754_v33  ;;  %v382_v35 = vsel %vm378_vm3, %v377_v34, -inf }
 0x3af   :  { %383 = vmax.xlane.f32.xlu1 %v382_v35 }
 0x3b1   :  { %v757_v36 = vpop.permute.xlu1 %756 }
 0x3b2   :  { %v758_v41 = vunpack.i.l.bf16 %v757_v36  ;;  %v759_v42 = vunpack.i.h.bf16 %v757_v36 }
 0x3b4   :  { %441 = vmatpush.msra.mxu3 %v758_v41 }
 0x3b6   :  { %442 = vmatpush.msra.mxu3 %v759_v42 }
 0x3bf   :  { %761 = vrot.lane.b32.xlu2 %v760_v63, %s811_s10 }
 0x3c7   :  { %771 = vrot.lane.b32.xlu2 %v770_v26, %s809_s9 }
 0x3c8   :  { %766 = vrot.lane.b32.xlu1 %v765_v25, %s809_s9 }
 0x41a   :  { %v381_v45 = vpop.xlane.xlu2 %380 }
 0x41b   :  { %v385_v62 = vsub.f32 %v376_v8, %v381_v45 }
 0x41d   :  { %v387_v48 = vmul.f32 1.442695, %v385_v62 }
 0x41f   :  { %789 = vpow2.f32 %v387_v48  ;;  %v34_v48 = vld [vmem:[%s1196_s2 + $0x38] sm:$0xff] }
 0x420   :  { %624 = vmatpush.msrb.mxu1 %v34_v48 }
 0x422   :  { %v762_v57 = vpop.permute.xlu2 %761  ;;  %v384_v49 = vpop.xlane.xlu1 %383 }
 0x423   :  { %v386_v59 = vsub.f32 %v377_v34, %v384_v49  ;;  %v763_v50 = vunpack.i.l.bf16 %v762_v57  ;;  %v764_v51 = vunpack.i.h.bf16 %v762_v57  ;;  %v33_v57 = vld [vmem:[%s1196_s2 + $0x28] sm:$0xff]  ;;  %v32_v49 = vld [vmem:[%s1196_s2 + $0x18] sm:$0xff] }
 0x424   :  { %625 = vmatpush.msrb.mxu1 %v33_v57 }
 0x425   :  { %v389_v17 = vmul.f32 1.442695, %v386_v59  ;;  %443 = vmatpush.msra.mxu3 %v763_v50  ;;  %v790_v52 = vpop.eup %789  ;;  %v31_v59 = vld [vmem:[%s1196_s2 + $0x8] sm:$0xff] }
 0x426   :  { %626 = vmatpush.msrb.mxu1 %v32_v49 }
 0x427   :  { %444 = vmatpush.msra.mxu3 %v764_v51  ;;  %791 = vpow2.f32 %v389_v17 }
 0x428   :  { %701 = vmatmul.msk.f32.vlgmr.msra.gmra.mxu3 %vm378_vm3, %v790_v52  ;;  %627 = vmatpush.msrb.mxu1 %v31_v59 }
 0x429   :  { %703 = vmatpush.msk.msrb.mxu3 %vm936_vm9, %v812_v23 }
 0x42a   :  { %v772_v26 = vpop.permute.xlu2 %771 }
 0x42b   :  { %704 = vmatpush.msk.msrb.mxu3 %vm932_vm8, %v812_v23  ;;  %v773_v13 = vunpack.i.l.bf16 %v772_v26  ;;  %v774_v29 = vunpack.i.h.bf16 %v772_v26 }
 0x42d   :  { %705 = vmatpush.msk.msrb.mxu3 %vm978_vm13, %v812_v23  ;;  %v792_v21 = vpop.eup %791 }
 0x42f   :  { %706 = vmatpush.msk.msrb.mxu3 %vm974_vm12, %v812_v23 }
 0x430   :  { %702 = vmatmul.msk.f32.gmra.mxu3 %vm378_vm3, %v792_v21 }
 0x431   :  { %707 = vmatpush.msk.msrb.mxu3 %vm956_vm11, %v812_v23 }
 0x433   :  { %708 = vmatpush.msk.msrb.mxu3 %vm952_vm10, %v812_v23 }
 0x435   :  { %709 = vmatpush.msk.msrb.mxu3 %vm999_vm15, %v812_v23 }
 0x437   :  { %710 = vmatpush.msk.msrb.mxu3 %vm995_vm14, %v812_v23  ;;  %v49_v23 = vld [vmem:[%s1197_s3 + $0x70] sm:$0xff] }
 0x438   :  { %711 = vmatmul.msk.f32.vlgmr.msrb.gmra.mxu3 %vm378_vm3, %v790_v52  ;;  %v50_v52 = vld [vmem:[%s1197_s3 + $0x78] sm:$0xff] }
 0x439   :  { %654 = vmatpush.msra.mxu2 %v50_v52 }
 0x43a   :  { %v767_v22 = vpop.permute.xlu1 %766 }
 0x43b   :  { %v768_v24 = vunpack.i.l.bf16 %v767_v22  ;;  %v769_v25 = vunpack.i.h.bf16 %v767_v22  ;;  %655 = vmatpush.msra.mxu2 %v49_v23 }
 0x43d   :  { %542 = vmatpush.msrb.mxu0 %v768_v24 }
 0x43f   :  { %543 = vmatpush.msrb.mxu0 %v769_v25  ;;  %v47_v25 = vld [vmem:[%s1197_s3 + $0x60] sm:$0xff] }
 0x440   :  { %712 = vmatmul.msk.f32.gmra.mxu3 %vm378_vm3, %v792_v21  ;;  %v48_v21 = vld [vmem:[%s1197_s3 + $0x68] sm:$0xff] }
 0x441   :  { %544 = vmatpush.msrb.mxu0 %v773_v13  ;;  %656 = vmatpush.msra.mxu2 %v48_v21  ;;  %v782_v21 = vld [vmem:[%s1195_s1 + $0x5] ss:$0 sm:$0xff] }
 0x443   :  { %545 = vmatpush.msrb.mxu0 %v774_v29  ;;  %657 = vmatpush.msra.mxu2 %v47_v25 }
 0x4ab   :  { %v446_v14 = vpop.f32.mrf.mxu3 }
 0x4b3   :  { %v449_v30 = vpop.f32.mrf.mxu3 }
 0x4bb   :  { %v469_v38 = vpop.f32.mrf.mxu3 }
 0x4bc   :  { %v475_v39 = vmax.f32 %v469_v38, 1e-30 }
 0x4be   :  { %793 = vrcp.f32 %v475_v39  ;;  %v488_v56 = vand.u32 2147483648, %v475_v39  ;;  %v486_v60 = vand.u32 2147483647, %v475_v39  ;;  %vm482_vm9 = vweird.f32 %v475_v39 }
 0x4c0   :  { %v489_v6 = vor.u32 1.1754944e-38, %v488_v56  ;;  %vm487_vm11 = vcmp.eq.f32.partialorder %v486_v60, 8.507059e+37  ;;  %v780_v56 = vld [vmem:[%s1195_s1 + $0x3] ss:$0 sm:$0xff] }
 0x4c3   :  { %v472_v46 = vpop.f32.mrf.mxu3 }
 0x4c4   :  { %v794_v47 = vpop.eup %793  ;;  %v476_v53 = vmax.f32 %v472_v46, 1e-30 }
 0x4c5   :  { %v478_v54 = vmul.f32 %v794_v47, %v475_v39  ;;  %vm483_vm8 = vweird.f32 %v794_v47 }
 0x4c6   :  { %795 = vrcp.f32 %v476_v53  ;;  %vm484_vm10 = vmor %vm482_vm9, %vm483_vm8  ;;  %v503_v19 = vand.u32 2147483648, %v476_v53  ;;  %v501_v27 = vand.u32 2147483647, %v476_v53  ;;  %vm497_vm13 = vweird.f32 %v476_v53 }
 0x4c7   :  { %v479_v55 = vsub.f32 1.0, %v478_v54 }
 0x4c8   :  { %v504_v31 = vor.u32 1.1754944e-38, %v503_v19  ;;  %vm502_vm15 = vcmp.eq.f32.partialorder %v501_v27, 8.507059e+37  ;;  %v45_v19 = vld [vmem:[%s1197_s3 + $0x50] sm:$0xff]  ;;  %v43_v27 = vld [vmem:[%s1197_s3 + $0x40] sm:$0xff] }
 0x4c9   :  { %v480_v58 = vmul.f32 %v794_v47, %v479_v55 }
 0x4cb   :  { %v481_v61 = vadd.f32 %v794_v47, %v480_v58 }
 0x4cc   :  { %v796_v1 = vpop.eup %795 }
 0x4cd   :  { %v493_v7 = vmul.f32 %v796_v1, %v476_v53  ;;  %v485_v11 = vsel %vm484_vm10, %v794_v47, %v481_v61  ;;  %vm498_vm12 = vweird.f32 %v796_v1 }
 0x4ce   :  { %v490_v12 = vsel %vm487_vm11, %v489_v6, %v485_v11  ;;  %vm499_vm14 = vmor %vm497_vm13, %vm498_vm12 }
 0x4cf   :  { %v494_v18 = vsub.f32 1.0, %v493_v7  ;;  %v491_v15 = vmul.f32 %v490_v12, %v446_v14 }
 0x4d1   :  { %713 = vmatmul.msk.f32.vlgmr.msrb.gmra.mxu0 %vm51_vm0, %v491_v15  ;;  %v495_v20 = vmul.f32 %v796_v1, %v494_v18  ;;  %v46_v15 = vld [vmem:[%s1197_s3 + $0x58] sm:$0xff] }
 0x4d2   :  { %658 = vmatpush.msra.mxu2 %v46_v15 }
 0x4d3   :  { %v496_v28 = vadd.f32 %v796_v1, %v495_v20  ;;  %v44_v20 = vld [vmem:[%s1197_s3 + $0x48] sm:$0xff] }
 0x4d4   :  { %659 = vmatpush.msra.mxu2 %v45_v19 }
 0x4d5   :  { %v500_v3 = vsel %vm499_vm14, %v796_v1, %v496_v28  ;;  %v42_v28 = vld [vmem:[%s1197_s3 + $0x38] sm:$0xff] }
 0x4d6   :  { %v505_v8 = vsel %vm502_vm15, %v504_v31, %v500_v3  ;;  %660 = vmatpush.msra.mxu2 %v44_v20  ;;  %v41_v31 = vld [vmem:[%s1197_s3 + $0x30] sm:$0xff]  ;;  %v40_v3 = vld [vmem:[%s1197_s3 + $0x28] sm:$0xff] }
 0x4d7   :  { %v506_v32 = vmul.f32 %v505_v8, %v449_v30  ;;  %v39_v8 = vld [vmem:[%s1197_s3 + $0x20] sm:$0xff] }
 0x4d8   :  { %661 = vmatpush.msra.mxu2 %v43_v27 }
 0x4d9   :  { %714 = vmatmul.msk.f32.gmra.mxu0 %vm51_vm0, %v506_v32  ;;  %v38_v32 = vld [vmem:[%s1197_s3 + $0x18] sm:$0xff] }
 0x4da   :  { %662 = vmatpush.msra.mxu2 %v42_v28 }
 0x4dc   :  { %663 = vmatpush.msra.mxu2 %v41_v31 }
 0x4de   :  { %664 = vmatpush.msra.mxu2 %v40_v3 }
 0x4e0   :  { %665 = vmatpush.msra.mxu2 %v39_v8 }
 0x4e2   :  { %666 = vmatpush.msra.mxu2 %v38_v32 }
 0x54e   :  { %v547_v5 = vpop.f32.mrf.mxu0 }
 0x54f   :  { %v548_v16 = vadd.f32 %v778_v4, %v547_v5  ;;  %v36_v5 = vld [vmem:[%s1197_s3 + $0x8] sm:$0xff] }
 0x551   :  { %v1093_v33 = vadd.f32 %v548_v16, %v841_v0  ;;  %v35_v16 = vld [vmem:[%s1197_s3] sm:$0xff] }
 0x553   :  { %v555_v34 = vsel %vm51_vm0, %v1093_v33, 0.0 }
 0x554   :  { %556 = vadd.xlane.f32.xlu2 %v555_v34  ;;  %v781_v34 = vld [vmem:[%s1195_s1 + $0x7] ss:$0 sm:$0xff] }
 0x556   :  { %v550_v35 = vpop.f32.mrf.mxu0 }
 0x557   :  { %v551_v36 = vadd.f32 %v778_v4, %v550_v35  ;;  %v37_v4 = vld [vmem:[%s1197_s3 + $0x10] sm:$0xff] }
 0x558   :  { %667 = vmatpush.msra.mxu2 %v37_v4 }
 0x559   :  { %v1098_v37 = vadd.f32 %v551_v36, %v848_v2 }
 0x55a   :  { %668 = vmatpush.msra.mxu2 %v36_v5 }
 0x55b   :  { %v558_v41 = vsel %vm51_vm0, %v1098_v37, 0.0 }
 0x55c   :  { %559 = vadd.xlane.f32.xlu1 %v558_v41  ;;  %669 = vmatpush.msra.mxu2 %v35_v16 }
 0x5c7   :  { %v557_v42 = vpop.xlane.xlu2 %556 }
 0x5c8   :  { %v561_v43 = vmul.f32 %v557_v42, %v852_v10 }
 0x5ca   :  { %v563_v40 = vsub.f32 %v1093_v33, %v561_v43 }
 0x5cc   :  { %v565_v0 = vmul.f32 %v563_v40, %v563_v40 }
 0x5ce   :  { %v567_v9 = vsel %vm51_vm0, %v565_v0, 0.0 }
 0x5cf   :  { %568 = vadd.xlane.f32.xlu0 %v567_v9  ;;  %v560_v44 = vpop.xlane.xlu1 %559 }
 0x5d0   :  { %v562_v63 = vmul.f32 %v560_v44, %v852_v10 }
 0x5d2   :  { %v564_v45 = vsub.f32 %v1098_v37, %v562_v63 }
 0x5d4   :  { %v566_v2 = vmul.f32 %v564_v45, %v564_v45 }
 0x5d6   :  { %v570_v62 = vsel %vm51_vm0, %v566_v2, 0.0 }
 0x5d7   :  { %571 = vadd.xlane.f32.xlu2 %v570_v62 }
 0x642   :  { %v569_v50 = vpop.xlane.xlu0 %568 }
 0x643   :  { %v573_v17 = vmul.f32 %v569_v50, %v852_v10 }
 0x645   :  { %v575_v51 = vadd.f32 1e-05, %v573_v17 }
 0x647   :  { %797 = vrsqrt.f32 %v575_v51  ;;  %vm583_vm1 = vweird.f32 %v575_v51 }
 0x64a   :  { %v572_v22 = vpop.xlane.xlu2 %571 }
 0x64b   :  { %v574_v24 = vmul.f32 %v572_v22, %v852_v10  ;;  %v779_v10 = vld [vmem:[%s1195_s1 + $0x2] ss:$0 sm:$0xff] }
 0x64d   :  { %v798_v26 = vpop.eup %797  ;;  %v576_v13 = vadd.f32 1e-05, %v574_v24 }
 0x64e   :  { %v578_v14 = vmul.f32 %v798_v26, %v575_v51  ;;  %vm584_vm7 = vweird.f32 %v798_v26 }
 0x64f   :  { %799 = vrsqrt.f32 %v576_v13  ;;  %vm585_vm2 = vmor %vm583_vm1, %vm584_vm7  ;;  %vm593_vm4 = vweird.f32 %v576_v13 }
 0x650   :  { %v579_v29 = vmul.f32 %v798_v26, %v578_v14 }
 0x652   :  { %v580_v30 = vmul.f32 0.5, %v579_v29 }
 0x654   :  { %v581_v38 = vsub.f32 1.5, %v580_v30 }
 0x655   :  { %v800_v39 = vpop.eup %799 }
 0x656   :  { %v582_v46 = vmul.f32 %v798_v26, %v581_v38  ;;  %v588_v47 = vmul.f32 %v800_v39, %v576_v13  ;;  %vm594_vm3 = vweird.f32 %v800_v39 }
 0x657   :  { %vm595_vm5 = vmor %vm593_vm4, %vm594_vm3 }
 0x658   :  { %v586_v53 = vsel %vm585_vm2, %v798_v26, %v582_v46  ;;  %v589_v54 = vmul.f32 %v800_v39, %v588_v47 }
 0x659   :  { %v597_v55 = vmul.f32 %v586_v53, %v563_v40 }
 0x65a   :  { %v590_v58 = vmul.f32 0.5, %v589_v54 }
 0x65b   :  { %v600_v60 = vmul.f32 %v779_v10, %v597_v55 }
 0x65c   :  { %v591_v61 = vsub.f32 1.5, %v590_v58 }
 0x65d   :  { %v603_v1 = vadd.f32 %v780_v56, %v600_v60 }
 0x65e   :  { %v592_v6 = vmul.f32 %v800_v39, %v591_v61 }
 0x65f   :  { %715 = vmatmul.msk.f32.vlgmr.msrb.gmra.mxu1 %vm51_vm0, %v603_v1 }
 0x660   :  { %v596_v7 = vsel %vm595_vm5, %v800_v39, %v592_v6 }
 0x661   :  { %v598_v11 = vmul.f32 %v596_v7, %v564_v45 }
 0x663   :  { %v601_v12 = vmul.f32 %v779_v10, %v598_v11 }
 0x665   :  { %v604_v18 = vadd.f32 %v780_v56, %v601_v12 }
 0x667   :  { %716 = vmatmul.msk.f32.gmra.mxu1 %vm51_vm0, %v604_v18 }
 0x6dc   :  { %v629_v35 = vpop.f32.mrf.mxu1 }
 0x6dd   :  { %v630_v36 = vadd.f32 %v781_v34, %v629_v35 }
 0x6df   :  { %v637_v41 = vmul.f32 0.044715, %v630_v36  ;;  %v635_v49 = vmul.f32 0.5, %v630_v36 }
 0x6e1   :  { %v639_v42 = vmul.f32 %v637_v41, %v630_v36 }
 0x6e3   :  { %v641_v43 = vmul.f32 %v639_v42, %v630_v36 }
 0x6e4   :  { %v632_v40 = vpop.f32.mrf.mxu1 }
 0x6e5   :  { %v633_v0 = vadd.f32 %v781_v34, %v632_v40  ;;  %v643_v9 = vadd.f32 %v641_v43, %v630_v36 }
 0x6e7   :  { %v645_v44 = vmul.f32 0.7978846, %v643_v9  ;;  %v638_v63 = vmul.f32 0.044715, %v633_v0  ;;  %v636_v51 = vmul.f32 0.5, %v633_v0 }
 0x6e9   :  { %801 = vtanh.f32 %v645_v44  ;;  %v640_v45 = vmul.f32 %v638_v63, %v633_v0 }
 0x6eb   :  { %v642_v2 = vmul.f32 %v640_v45, %v633_v0 }
 0x6ed   :  { %v644_v62 = vadd.f32 %v642_v2, %v633_v0 }
 0x6ef   :  { %v802_v48 = vpop.eup %801  ;;  %v646_v57 = vmul.f32 0.7978846, %v644_v62 }
 0x6f0   :  { %v649_v59 = vadd.f32 1.0, %v802_v48 }
 0x6f1   :  { %803 = vtanh.f32 %v646_v57 }
 0x6f2   :  { %v651_v50 = vmul.f32 %v649_v59, %v635_v49 }
 0x6f4   :  { %670 = vmatmul.f32.vlgmr.msra.gmra.mxu2 %v651_v50 }
 0x6f7   :  { %v804_v17 = vpop.eup %803 }
 0x6f8   :  { %v650_v52 = vadd.f32 1.0, %v804_v17 }
 0x6fa   :  { %v652_v23 = vmul.f32 %v650_v52, %v636_v51 }
 0x6fc   :  { %673 = vmatmul.f32.gmra.mxu2 %v652_v23 }
 0x777   :  { %v671_v22 = vpop.f32.mrf.mxu2 }
 0x778   :  { %v672_v24 = vadd.f32 %v782_v21, %v671_v22 }
 0x77a   :  { %v677_v25 = vadd.f32 %v672_v24, %v1093_v33 }
 0x77c   :  { %679 = vst.msk [vmem:[%s1198_s4] sm:$0xff] %vm51_vm0, %v677_v25 }
 0x77f   :  { %v674_v26 = vpop.f32.mrf.mxu2 }
 0x780   :  { %v675_v13 = vadd.f32 %v782_v21, %v674_v26 }
 0x782   :  { %v678_v14 = vadd.f32 %v675_v13, %v1098_v37 }
 0x784   :  { %680 = vst.msk [vmem:[%s1198_s4 + $0x8] sm:$0xff] %vm51_vm0, %v678_v14 }

</bundles_post_ra>
